<compile_context>
chip_gen: v5e
topology: v5e:2x2
jax: 0.10.0
libtpu: 0.0.40
codegen_flags: <defaults>
</compile_context>

<pallas_src>
import functools

import jax
import jax.numpy as jnp
import numpy as np
from jax.experimental import pallas as pl
from jax.experimental.pallas import tpu as pltpu


# ----------------------------------------------------------------------------
# helpers
# ----------------------------------------------------------------------------
def _pick_tile(n, candidates):
    """Largest candidate tile that evenly divides n; falls back to full extent."""
    for t in candidates:
        if n >= t and n % t == 0:
            return t
    return n


# ----------------------------------------------------------------------------
# Kernel 1: K-tiled dense linear  y = x @ W + b   (optional fused ReLU)
# ----------------------------------------------------------------------------
def _linear_kernel(x_ref, w_ref, b_ref, o_ref, acc_ref, *, activation):
    @pl.when(pl.program_id(2) == 0)
    def _init():
        acc_ref[...] = jnp.zeros_like(acc_ref)

    acc_ref[...] += jnp.dot(x_ref[...], w_ref[...],
                            preferred_element_type=jnp.float32)

    @pl.when(pl.program_id(2) == pl.num_programs(2) - 1)
    def _finalize():
        y = acc_ref[...] + b_ref[...].astype(jnp.float32)
        if activation == "relu":
            y = jnp.maximum(y, 0.0)
        o_ref[...] = y.astype(o_ref.dtype)


def linear(x2d, w, b, activation=None):
    """x2d: (N, d_in); w: (d_in, d_out) pre-transposed weight; b: (d_out,)."""
    n, d_in = x2d.shape
    d_out = w.shape[1]
    # tm/tn capped at 256 (v5e scoped-VMEM safety, v6e/v7x 256-wide MXU);
    # tk >= 256 when it divides so the contraction fills the MXU.
    tm = _pick_tile(n, (256, 128))
    tn = _pick_tile(d_out, (256, 128))
    tk = _pick_tile(d_in, (512, 256, 128))
    b2 = b.reshape(1, d_out)
    kernel = functools.partial(_linear_kernel, activation=activation)
    return pl.pallas_call(
        kernel,
        out_shape=jax.ShapeDtypeStruct((n, d_out), x2d.dtype),
        grid=(n // tm, d_out // tn, d_in // tk),
        in_specs=[
            pl.BlockSpec((tm, tk), lambda i, j, k: (i, k)),
            pl.BlockSpec((tk, tn), lambda i, j, k: (k, j)),
            pl.BlockSpec((1, tn), lambda i, j, k: (0, j)),
        ],
        out_specs=pl.BlockSpec((tm, tn), lambda i, j, k: (i, j)),
        scratch_shapes=[pltpu.VMEM((tm, tn), jnp.float32)],
        compiler_params=pltpu.CompilerParams(
            dimension_semantics=("parallel", "parallel", "arbitrary")),
    )(x2d, w, b2)


# ----------------------------------------------------------------------------
# Kernel 2: fused residual-add + LayerNorm
# ----------------------------------------------------------------------------
def _add_layernorm_kernel(x_ref, y_ref, g_ref, b_ref, o_ref, *, eps):
    z = (x_ref[...] + y_ref[...]).astype(jnp.float32)
    mu = jnp.mean(z, axis=-1, keepdims=True)
    d = z - mu
    var = jnp.mean(d * d, axis=-1, keepdims=True)
    inv = jax.lax.rsqrt(var + eps)
    o_ref[...] = (d * inv * g_ref[...] + b_ref[...]).astype(o_ref.dtype)


def add_layernorm(x2d, y2d, gamma, beta, eps=1e-6):
    n, d = x2d.shape
    tm = _pick_tile(n, (256, 128))
    kernel = functools.partial(_add_layernorm_kernel, eps=eps)
    return pl.pallas_call(
        kernel,
        out_shape=jax.ShapeDtypeStruct((n, d), x2d.dtype),
        grid=(n // tm,),
        in_specs=[
            pl.BlockSpec((tm, d), lambda i: (i, 0)),
            pl.BlockSpec((tm, d), lambda i: (i, 0)),
            pl.BlockSpec((1, d), lambda i: (0, 0)),
            pl.BlockSpec((1, d), lambda i: (0, 0)),
        ],
        out_specs=pl.BlockSpec((tm, d), lambda i: (i, 0)),
        compiler_params=pltpu.CompilerParams(dimension_semantics=("parallel",)),
    )(x2d, y2d, gamma.reshape(1, d), beta.reshape(1, d))


# ----------------------------------------------------------------------------
# Kernel 3: scaled dot-product attention — grid over (batch, head)
# ----------------------------------------------------------------------------
def _attention_kernel(q_ref, k_ref, v_ref, ktok_ref, o_ref, w_ref,
                      *, scale, causal, pad_id):
    # one (batch, head) pair per grid step: every block is a clean 2-D tile
    q = q_ref[0, 0].astype(jnp.float32) * scale    # scale folded into q (Sq, d_k)
    k = k_ref[0, 0].astype(jnp.float32)            # (Sk, d_k)
    v = v_ref[0, 0].astype(jnp.float32)            # (Sk, d_k)
    sq = q.shape[0]
    sk = k.shape[0]

    # mask built in-kernel: padding (key token == pad) OR causal (key > query).
    # NOTE: rows that are fully masked produce uniform weights (same as the
    # PyTorch reference: masked_fill(-1e9) then softmax).
    pad_mask = ktok_ref[0] == pad_id                       # (1, Sk) bool
    masked = jnp.broadcast_to(pad_mask, (sq, sk))
    if causal:
        row = jax.lax.broadcasted_iota(jnp.int32, (sq, sk), 0)
        col = jax.lax.broadcasted_iota(jnp.int32, (sq, sk), 1)
        masked = jnp.logical_or(masked, col > row)

    scores = jax.lax.dot_general(q, k, (((1,), (1,)), ((), ())),
                                 preferred_element_type=jnp.float32)
    scores = jnp.where(masked, jnp.float32(-1e9), scores)
    scores = scores - jnp.max(scores, axis=-1, keepdims=True)
    e = jnp.exp(scores)
    denom = jnp.sum(e, axis=-1, keepdims=True)
    weights = e / denom                           # exact: weights are an output
    w_ref[0, 0] = weights.astype(w_ref.dtype)
    out = jnp.dot(weights, v, preferred_element_type=jnp.float32)
    o_ref[0, 0] = out.astype(o_ref.dtype)


def attention(q_h, k_h, v_h, k_tokens, causal, pad_id):
    """q_h: (B, H, Sq, d_k); k_h/v_h: (B, H, Sk, d_k); k_tokens: (B, Sk) int32."""
    B, H, Sq, d_k = q_h.shape
    Sk = k_h.shape[2]
    scale = float(1.0 / np.sqrt(d_k))
    ktok = k_tokens.astype(jnp.int32).reshape(B, 1, Sk)
    kernel = functools.partial(_attention_kernel, scale=scale,
                               causal=causal, pad_id=pad_id)
    out, weights = pl.pallas_call(
        kernel,
        out_shape=(
            jax.ShapeDtypeStruct((B, H, Sq, d_k), q_h.dtype),
            jax.ShapeDtypeStruct((B, H, Sq, Sk), jnp.float32),
        ),
        grid=(B, H),
        in_specs=[
            pl.BlockSpec((1, 1, Sq, d_k), lambda b, h: (b, h, 0, 0)),
            pl.BlockSpec((1, 1, Sk, d_k), lambda b, h: (b, h, 0, 0)),
            pl.BlockSpec((1, 1, Sk, d_k), lambda b, h: (b, h, 0, 0)),
            pl.BlockSpec((1, 1, Sk), lambda b, h: (b, 0, 0)),
        ],
        out_specs=(
            pl.BlockSpec((1, 1, Sq, d_k), lambda b, h: (b, h, 0, 0)),
            pl.BlockSpec((1, 1, Sq, Sk), lambda b, h: (b, h, 0, 0)),
        ),
        compiler_params=pltpu.CompilerParams(
            dimension_semantics=("parallel", "parallel")),
    )(q_h, k_h, v_h, ktok)
    return out, weights


# ----------------------------------------------------------------------------
# MultiHeadAttention / FFN / layers (Pallas kernels + thin JAX glue)
# ----------------------------------------------------------------------------
def multi_head_attention(p, Q, K, V, k_tokens, causal, n_heads, pad_id):
    B, Sq, d_model = Q.shape
    Sk = K.shape[1]
    d_k = d_model // n_heads

    if (Q is K) and (K is V):
        # self-attention: single fused QKV projection (one activation read)
        qkv = linear(Q.reshape(B * Sq, d_model), p["w_qkv"], p["b_qkv"])
        qkv = qkv.reshape(B, Sq, 3, n_heads, d_k).transpose(2, 0, 3, 1, 4)
        q_h, k_h, v_h = qkv[0], qkv[1], qkv[2]           # (B, H, S, d_k) each
    else:
        # cross-attention: Q from decoder states, fused KV from encoder outputs
        q_h = linear(Q.reshape(B * Sq, d_model), p["w_q"], p["b_q"])
        q_h = q_h.reshape(B, Sq, n_heads, d_k).transpose(0, 2, 1, 3)
        kv = linear(K.reshape(B * Sk, d_model), p["w_kv"], p["b_kv"])
        kv = kv.reshape(B, Sk, 2, n_heads, d_k).transpose(2, 0, 3, 1, 4)
        k_h, v_h = kv[0], kv[1]

    attn, attn_weights = attention(q_h, k_h, v_h, k_tokens, causal, pad_id)
    attn = attn.transpose(0, 2, 1, 3).reshape(B * Sq, d_model)   # merge heads
    out = linear(attn, p["w_o"], p["b_o"])
    return out.reshape(B, Sq, d_model), attn_weights


def ffn_forward(p, x):
    B, S, d_model = x.shape
    h = linear(x.reshape(B * S, d_model), p["w1"], p["b1"], activation="relu")
    y = linear(h, p["w2"], p["b2"])
    return y.reshape(B, S, d_model)


def encoder_layer(p, x, enc_tokens, n_heads, pad_id):
    B, S, d_model = x.shape
    a, w = multi_head_attention(p["mha"], x, x, x, enc_tokens, False, n_heads, pad_id)
    # TODO(synk): dropout layers are identity (inference forward)
    x = add_layernorm(x.reshape(-1, d_model), a.reshape(-1, d_model),
                      p["ln1_g"], p["ln1_b"]).reshape(B, S, d_model)
    f = ffn_forward(p["ffn"], x)
    x = add_layernorm(x.reshape(-1, d_model), f.reshape(-1, d_model),
                      p["ln2_g"], p["ln2_b"]).reshape(B, S, d_model)
    return x, w


def decoder_layer(p, x, enc_out, dec_tokens, enc_tokens, n_heads, pad_id):
    B, S, d_model = x.shape
    a1, w1 = multi_head_attention(p["mha1"], x, x, x, dec_tokens, True, n_heads, pad_id)
    x = add_layernorm(x.reshape(-1, d_model), a1.reshape(-1, d_model),
                      p["ln1_g"], p["ln1_b"]).reshape(B, S, d_model)
    a2, w2 = multi_head_attention(p["mha2"], x, enc_out, enc_out,
                                  enc_tokens, False, n_heads, pad_id)
    x = add_layernorm(x.reshape(-1, d_model), a2.reshape(-1, d_model),
                      p["ln2_g"], p["ln2_b"]).reshape(B, S, d_model)
    f = ffn_forward(p["ffn"], x)
    x = add_layernorm(x.reshape(-1, d_model), f.reshape(-1, d_model),
                      p["ln3_g"], p["ln3_b"]).reshape(B, S, d_model)
    return x, w1, w2


# ----------------------------------------------------------------------------
# masks (reference only) / embeddings (plain JAX glue)
# ----------------------------------------------------------------------------
def padding_mask(q_tokens, k_tokens, pad_id):
    B, Lq = q_tokens.shape
    Lk = k_tokens.shape[1]
    return jnp.broadcast_to((k_tokens == pad_id)[:, None, :], (B, Lq, Lk))


def subsequent_mask(q_tokens):
    B, L = q_tokens.shape
    m = jnp.triu(jnp.ones((L, L), jnp.bool_), k=1)
    return jnp.broadcast_to(m[None], (B, L, L))


def embed(tokens, emb_table, pos_table, pad_id):
    B, S = tokens.shape
    positions = jnp.broadcast_to(jnp.arange(1, S + 1, dtype=jnp.int32)[None, :], (B, S))
    positions = jnp.where(tokens == pad_id, 0, positions)
    # TODO(synk): embedding gathers stay in XLA (jnp.take); a Pallas DMA-gather
    # kernel is not worthwhile at these sizes.
    return jnp.take(emb_table, tokens, axis=0) + jnp.take(pos_table, positions, axis=0)


def transformer_forward(params, enc_tokens, dec_tokens, n_heads, pad_id):
    enc_p, dec_p = params["encoder"], params["decoder"]

    # ---- encoder ----
    x = embed(enc_tokens, enc_p["embedding"], params["pos_table"], pad_id)
    enc_attns = []
    for lp in enc_p["layers"]:
        x, w = encoder_layer(lp, x, enc_tokens, n_heads, pad_id)
        enc_attns.append(w)
    enc_out = x

    # ---- decoder ----
    y = embed(dec_tokens, dec_p["embedding"], params["pos_table"], pad_id)
    dec_attns, cross_attns = [], []
    for lp in dec_p["layers"]:
        y, w1, w2 = decoder_layer(lp, y, enc_out, dec_tokens, enc_tokens,
                                  n_heads, pad_id)
        dec_attns.append(w1)
        cross_attns.append(w2)

    # ---- final vocab projection (largest W: big tm + K-tiling keeps W streaming) ----
    B, S, d_model = y.shape
    logits = linear(y.reshape(B * S, d_model), params["w_out"], params["b_out"])
    return logits.reshape(B, S, -1), enc_attns, dec_attns, cross_attns


# ----------------------------------------------------------------------------
# pure-JAX reference (sanity check)
# ----------------------------------------------------------------------------
def ref_linear(x, w, b):
    return x @ w + b


def ref_layernorm(x, g, b, eps=1e-6):
    mu = x.mean(-1, keepdims=True)
    var = ((x - mu) ** 2).mean(-1, keepdims=True)
    return (x - mu) / jnp.sqrt(var + eps) * g + b


def ref_mha(p, Q, K, V, mask, n_heads):
    B, Sq, d_model = Q.shape
    Sk = K.shape[1]
    d_k = d_model // n_heads
    q = ref_linear(Q, p["w_q"], p["b_q"])
    k = ref_linear(K, p["w_kv"][:, :d_model], p["b_kv"][:d_model])
    v = ref_linear(V, p["w_kv"][:, d_model:], p["b_kv"][d_model:])
    qh = q.reshape(B, Sq, n_heads, d_k).transpose(0, 2, 1, 3)
    kh = k.reshape(B, Sk, n_heads, d_k).transpose(0, 2, 1, 3)
    vh = v.reshape(B, Sk, n_heads, d_k).transpose(0, 2, 1, 3)
    scores = jnp.einsum("bhqd,bhkd->bhqk", qh, kh) / np.sqrt(d_k)
    scores = jnp.where(mask[:, None], -1e9, scores)
    w = jax.nn.softmax(scores, axis=-1)
    attn = jnp.einsum("bhqk,bhkd->bhqd", w, vh)
    attn = attn.transpose(0, 2, 1, 3).reshape(B, Sq, d_model)
    return ref_linear(attn, p["w_o"], p["b_o"]), w


def ref_ffn(p, x):
    return ref_linear(jnp.maximum(ref_linear(x, p["w1"], p["b1"]), 0.0), p["w2"], p["b2"])


def ref_encoder_layer(p, x, mask, n_heads):
    a, w = ref_mha(p["mha"], x, x, x, mask, n_heads)
    x = ref_layernorm(x + a, p["ln1_g"], p["ln1_b"])
    f = ref_ffn(p["ffn"], x)
    x = ref_layernorm(x + f, p["ln2_g"], p["ln2_b"])
    return x, w


def ref_decoder_layer(p, x, enc_out, self_mask, cross_mask, n_heads):
    a1, w1 = ref_mha(p["mha1"], x, x, x, self_mask, n_heads)
    x = ref_layernorm(x + a1, p["ln1_g"], p["ln1_b"])
    a2, w2 = ref_mha(p["mha2"], x, enc_out, enc_out, cross_mask, n_heads)
    x = ref_layernorm(x + a2, p["ln2_g"], p["ln2_b"])
    f = ref_ffn(p["ffn"], x)
    x = ref_layernorm(x + f, p["ln3_g"], p["ln3_b"])
    return x, w1, w2


def ref_transformer_forward(params, enc_tokens, dec_tokens, n_heads, pad_id):
    enc_p, dec_p = params["encoder"], params["decoder"]
    x = embed(enc_tokens, enc_p["embedding"], params["pos_table"], pad_id)
    enc_self_mask = padding_mask(enc_tokens, enc_tokens, pad_id)
    enc_attns = []
    for lp in enc_p["layers"]:
        x, w = ref_encoder_layer(lp, x, enc_self_mask, n_heads)
        enc_attns.append(w)
    enc_out = x
    y = embed(dec_tokens, dec_p["embedding"], params["pos_table"], pad_id)
    dec_self_mask = jnp.logical_or(padding_mask(dec_tokens, dec_tokens, pad_id),
                                   subsequent_mask(dec_tokens))
    cross_mask = padding_mask(dec_tokens, enc_tokens, pad_id)
    dec_attns, cross_attns = [], []
    for lp in dec_p["layers"]:
        y, w1, w2 = ref_decoder_layer(lp, y, enc_out, dec_self_mask, cross_mask, n_heads)
        dec_attns.append(w1)
        cross_attns.append(w2)
    logits = ref_linear(y, params["w_out"], params["b_out"])
    return logits, enc_attns, dec_attns, cross_attns


# ----------------------------------------------------------------------------
# parameter init (synthetic, deterministic; weights stored pre-transposed)
# ----------------------------------------------------------------------------
def init_linear_params(key, d_in, d_out, scale=0.05):
    kw, kb = jax.random.split(key)
    w = jax.random.normal(kw, (d_in, d_out), jnp.float32) * scale
    b = jax.random.normal(kb, (d_out,), jnp.float32) * scale
    return w, b


def init_mha_params(key, d_model):
    k1, k2 = jax.random.split(key)
    w_qkv, b_qkv = init_linear_params(k1, d_model, 3 * d_model)
    w_o, b_o = init_linear_params(k2, d_model, d_model)
    return {
        "w_qkv": w_qkv, "b_qkv": b_qkv,
        "w_q": w_qkv[:, :d_model], "b_q": b_qkv[:d_model],
        "w_kv": w_qkv[:, d_model:], "b_kv": b_qkv[d_model:],
        "w_o": w_o, "b_o": b_o,
    }


def init_ffn_params(key, d_model, d_ff):
    k1, k2 = jax.random.split(key)
    w1, b1 = init_linear_params(k1, d_model, d_ff)
    w2, b2 = init_linear_params(k2, d_ff, d_model)
    return {"w1": w1, "b1": b1, "w2": w2, "b2": b2}


def init_encoder_layer(key, d_model, d_ff):
    k1, k2 = jax.random.split(key)
    ones = jnp.ones((d_model,), jnp.float32)
    zeros = jnp.zeros((d_model,), jnp.float32)
    return {"mha": init_mha_params(k1, d_model),
            "ffn": init_ffn_params(k2, d_model, d_ff),
            "ln1_g": ones, "ln1_b": zeros, "ln2_g": ones, "ln2_b": zeros}


def init_decoder_layer(key, d_model, d_ff):
    k1, k2, k3 = jax.random.split(key, 3)
    ones = jnp.ones((d_model,), jnp.float32)
    zeros = jnp.zeros((d_model,), jnp.float32)
    return {"mha1": init_mha_params(k1, d_model),
            "mha2": init_mha_params(k2, d_model),
            "ffn": init_ffn_params(k3, d_model, d_ff),
            "ln1_g": ones, "ln1_b": zeros,
            "ln2_g": ones, "ln2_b": zeros,
            "ln3_g": ones, "ln3_b": zeros}


def sinusoid_table(n_pos, d_model):
    tab = np.zeros((n_pos, d_model), np.float32)
    for pos in range(n_pos):
        for i in range(d_model):
            angle = pos / np.power(10000, 2 * (i // 2) / d_model)
            tab[pos, i] = np.sin(angle) if i % 2 == 0 else np.cos(angle)
    return jnp.asarray(tab)


def init_transformer(key, src_vocab, tgt_vocab, seq_len, d_model, n_layers, d_ff):
    ks = jax.random.split(key, 2 * n_layers + 3)
    enc_layers = [init_encoder_layer(ks[i], d_model, d_ff) for i in range(n_layers)]
    dec_layers = [init_decoder_layer(ks[n_layers + i], d_model, d_ff) for i in range(n_layers)]
    enc_emb = jax.random.normal(ks[-3], (src_vocab, d_model), jnp.float32) * 0.05
    dec_emb = jax.random.normal(ks[-2], (tgt_vocab, d_model), jnp.float32) * 0.05
    w_out, b_out = init_linear_params(ks[-1], d_model, tgt_vocab)
    return {"pos_table": sinusoid_table(seq_len + 1, d_model),
            "encoder": {"embedding": enc_emb, "layers": enc_layers},
            "decoder": {"embedding": dec_emb, "layers": dec_layers},
            "w_out": w_out, "b_out": b_out}


# ----------------------------------------------------------------------------
if __name__ == "__main__":
    src_vocab, tgt_vocab = 64, 128
    seq_len = 8
    d_model, n_layers, n_heads, d_ff = 32, 2, 4, 64
    pad_id = 0
    B = 2

    key = jax.random.PRNGKey(0)
    k_param, k_enc, k_dec = jax.random.split(key, 3)
    params = init_transformer(k_param, src_vocab, tgt_vocab, seq_len,
                              d_model, n_layers, d_ff)

    enc_tokens = jax.random.randint(k_enc, (B, seq_len), 1, src_vocab, dtype=jnp.int32)
    dec_tokens = jax.random.randint(k_dec, (B, seq_len), 1, tgt_vocab, dtype=jnp.int32)
    # introduce some padding to exercise pad masks (never a fully-masked row)
    enc_tokens = enc_tokens.at[0, 6:].set(pad_id)
    dec_tokens = dec_tokens.at[1, 7:].set(pad_id)

    logits, enc_attns, dec_attns, cross_attns = transformer_forward(
        params, enc_tokens, dec_tokens, n_heads, pad_id)
    logits = jax.block_until_ready(logits)
    enc_attns = [jax.block_until_ready(a) for a in enc_attns]
    dec_attns = [jax.block_until_ready(a) for a in dec_attns]
    cross_attns = [jax.block_until_ready(a) for a in cross_attns]

    r_logits, r_enc, r_dec, r_cross = ref_transformer_forward(
        params, enc_tokens, dec_tokens, n_heads, pad_id)

    assert logits.shape == (B, seq_len, tgt_vocab)
    np.testing.assert_allclose(np.asarray(logits), np.asarray(r_logits),
                               rtol=2e-3, atol=2e-3)
    for got, ref in zip(enc_attns + dec_attns + cross_attns, r_enc + r_dec + r_cross):
        assert got.shape == (B, n_heads, seq_len, seq_len)
        np.testing.assert_allclose(np.asarray(got), np.asarray(ref),
                                   rtol=2e-3, atol=2e-3)

    print("KERNEL_OK")
</pallas_src>

<mosaic_0001>
module attributes {stable_mosaic.version = 11 : i64} {
  func.func @_linear_kernel(%arg0: i32, %arg1: i32, %arg2: i32, %arg3: memref<16x32xf32, #tpu.memory_space<vmem>>, %arg4: memref<32x96xf32, #tpu.memory_space<vmem>>, %arg5: memref<1x96xf32, #tpu.memory_space<vmem>>, %arg6: memref<16x96xf32, #tpu.memory_space<vmem>>, %arg7: memref<16x96xf32, #tpu.memory_space<vmem>>) attributes {dimension_semantics = [#tpu.dimension_semantics<parallel>, #tpu.dimension_semantics<parallel>, #tpu.dimension_semantics<arbitrary>], iteration_bounds = array<i64: 1, 1, 1>, scalar_prefetch = 0 : i64, scratch_operands = 1 : i64, tpu.core_type = #tpu.core_type<tc>, window_params = [{transform_indices = @transform_0, window_bounds = array<i64: 16, 32>}, {transform_indices = @transform_1, window_bounds = array<i64: 32, 96>}, {transform_indices = @transform_2, window_bounds = array<i64: 1, 96>}, {transform_indices = @transform_3, window_bounds = array<i64: 16, 96>}]} {
    %c0_i32 = arith.constant 0 : i32
    %0 = arith.cmpi eq, %arg2, %c0_i32 : i32
    %1 = arith.extui %0 : i1 to i32
    %c0_i32_0 = arith.constant 0 : i32
    %2 = arith.cmpi ne, %1, %c0_i32_0 : i32
    scf.if %2 {
      %cst_10 = arith.constant 0.000000e+00 : f32
      %12 = vector.broadcast %cst_10 : f32 to vector<16x96xf32>
      %c0_11 = arith.constant 0 : index
      %c0_12 = arith.constant 0 : index
      %13 = vector.load %arg7[%c0_11, %c0_12] : memref<16x96xf32, #tpu.memory_space<vmem>>, vector<16x96xf32>
      tpu.vector_store %arg7[%c0_11, %c0_12], %12 {strides = array<i32>} : memref<16x96xf32, #tpu.memory_space<vmem>>, vector<16x96xf32>,
    } else {
    }
    %c0 = arith.constant 0 : index
    %c0_1 = arith.constant 0 : index
    %3 = vector.load %arg7[%c0, %c0_1] : memref<16x96xf32, #tpu.memory_space<vmem>>, vector<16x96xf32>
    %c0_2 = arith.constant 0 : index
    %c0_3 = arith.constant 0 : index
    %4 = vector.load %arg3[%c0_2, %c0_3] : memref<16x32xf32, #tpu.memory_space<vmem>>, vector<16x32xf32>
    %c0_4 = arith.constant 0 : index
    %c0_5 = arith.constant 0 : index
    %5 = vector.load %arg4[%c0_4, %c0_5] : memref<32x96xf32, #tpu.memory_space<vmem>>, vector<32x96xf32>
    %cst = arith.constant dense<0.000000e+00> : vector<16x96xf32>
    %6 = tpu.matmul %4, %5, %cst {dimension_numbers = #tpu.dot_dimension_numbers<[1], [0], [0], [1], [0, 0, 1, 1], [], []>} : vector<16x32xf32>, vector<32x96xf32>, vector<16x96xf32> -> vector<16x96xf32>
    %7 = arith.addf %3, %6 : vector<16x96xf32>
    %c0_6 = arith.constant 0 : index
    %c0_7 = arith.constant 0 : index
    %8 = vector.load %arg7[%c0_6, %c0_7] : memref<16x96xf32, #tpu.memory_space<vmem>>, vector<16x96xf32>
    tpu.vector_store %arg7[%c0_6, %c0_7], %7 {strides = array<i32>} : memref<16x96xf32, #tpu.memory_space<vmem>>, vector<16x96xf32>,
    %c0_i32_8 = arith.constant 0 : i32
    %9 = arith.cmpi eq, %arg2, %c0_i32_8 : i32
    %10 = arith.extui %9 : i1 to i32
    %c0_i32_9 = arith.constant 0 : i32
    %11 = arith.cmpi ne, %10, %c0_i32_9 : i32
    scf.if %11 {
      %c0_10 = arith.constant 0 : index
      %c0_11 = arith.constant 0 : index
      %12 = vector.load %arg7[%c0_10, %c0_11] : memref<16x96xf32, #tpu.memory_space<vmem>>, vector<16x96xf32>
      %c0_12 = arith.constant 0 : index
      %c0_13 = arith.constant 0 : index
      %13 = vector.load %arg5[%c0_12, %c0_13] : memref<1x96xf32, #tpu.memory_space<vmem>>, vector<1x96xf32>
      %14 = vector.broadcast %13 : vector<1x96xf32> to vector<16x96xf32>
      %15 = arith.addf %12, %14 : vector<16x96xf32>
      %c0_14 = arith.constant 0 : index
      %c0_15 = arith.constant 0 : index
      %16 = vector.load %arg6[%c0_14, %c0_15] : memref<16x96xf32, #tpu.memory_space<vmem>>, vector<16x96xf32>
      tpu.vector_store %arg6[%c0_14, %c0_15], %15 {strides = array<i32>} : memref<16x96xf32, #tpu.memory_space<vmem>>, vector<16x96xf32>,
    } else {
    }
    return
  }
  func.func @transform_0(%arg0: i32, %arg1: i32, %arg2: i32) -> (i32, i32) {
    %c0_i32 = arith.constant 0 : i32
    return %arg0, %arg2 : i32, i32
  }
  func.func @transform_1(%arg0: i32, %arg1: i32, %arg2: i32) -> (i32, i32) {
    %c0_i32 = arith.constant 0 : i32
    return %arg2, %arg1 : i32, i32
  }
  func.func @transform_2(%arg0: i32, %arg1: i32, %arg2: i32) -> (i32, i32) {
    %c0_i32 = arith.constant 0 : i32
    %c0_i32_0 = arith.constant 0 : i32
    return %c0_i32, %arg1 : i32, i32
  }
  func.func @transform_3(%arg0: i32, %arg1: i32, %arg2: i32) -> (i32, i32) {
    %c0_i32 = arith.constant 0 : i32
    return %arg0, %arg1 : i32, i32
  }
}

</mosaic_0001>

<bundles_post_ra>
// kernel: tpu_custom_call.1
= control target key start
LH: loop header
LB: loop body
LE: loop exit
PB: predicated region body
PF: predicated region fallthrough
CT: control target
= control target key end

     0   :  { %8 = vsyncpa [#allocation4], 0  ;;  %s274_s0 = inlined_call_operand.hbm [shape: f32[16,32], index: 0, kind: input, shape index: {}]   ;;  %s275_s1 = inlined_call_operand.hbm [shape: f32[32,96], index: 1, kind: input, shape index: {}]   ;;  %s276_s2 = inlined_call_operand.vmem [shape: f32[1,96], index: 2, kind: input, shape index: {}]   ;;  %s277_s3 = inlined_call_operand.hbm [shape: f32[16,96], index: 3, kind: output, shape index: {}]  }
   0x1   :  { %9 = vsyncpa [#allocation7], 0 }
   0x2   :  { %10 = vsyncpa [#allocation5], 0  ;;  %s15_s14 = sshll.u32 %s274_s0, 4  ;;  %s221_s15 = smov [#allocation3]   ;;  %s16_s14 = int_to_ptr.hbm [resolvable:$true] %s15_s14 }
   0x3   :  { %s17_s16 = sshll.u32 %s221_s15, 4  ;;  %s28_s19 = sshll.u32 %s275_s1, 4  ;;  %s18_s16 = int_to_ptr.vmem [resolvable:$true] %s17_s16  ;;  %s29_s19 = int_to_ptr.hbm [resolvable:$true] %s28_s19 }
   0x4   :  { %s222_s20 = smov 128   ;;  %s223_s21 = smov 8  }
   0x5   :  { %23 = dma.hbm_to_vmem [thread:$0]  %s16_s14, 256, %s18_s16, [#allocation4], %s222_s20, %s222_s20, %s223_s21  }
   0x6   :  { %s224_s22 = smov [#allocation6]  }
   0x7   :  { %s30_s23 = sshll.u32 %s224_s22, 4  ;;  %s31_s23 = int_to_ptr.vmem [resolvable:$true] %s30_s23 }
   0x8   :  { %36 = dma.hbm_to_vmem [thread:$0]  %s29_s19, 512, %s31_s23, [#allocation7], %s222_s20, %s222_s20, %s223_s21  }
   0x9   :  { %215 = dma.done.wait [#allocation4], 256  }
   0xa   :  { %216 = vsyncadd [#allocation4], 4294967040 }
   0xb   :  { %217 = dma.done.wait [#allocation7], 512  }
   0xc   :  { %218 = vsyncadd [#allocation7], 4294966784  ;;  %vm51_vm0 = vcmask 785408   ;;  %v225_v0 = vmov 0.0   ;;  %v61_v1 = vld [vmem:[#allocation6 + $0x18] sm:$0xff]  ;;  %v60_v2 = vld [vmem:[#allocation6 + $0x10] sm:$0xff] }
   0xd   :  { %52 = vst.msk [vmem:[#allocation2] sm:$0xff] %vm51_vm0, %v225_v0  ;;  %81 = vmatpush.msra.mxu0 %v61_v1  ;;  %132 = vmatpush.msra.mxu1 %v61_v1  ;;  %v59_v3 = vld [vmem:[#allocation6 + $0x8] sm:$0xff]  ;;  %v58_v4 = vld [vmem:[#allocation6] sm:$0xff]  ;;  %v56_v5 = vld [vmem:[#allocation3] sm:$0xff]  ;;  %vm62_vm1 = vcmask 261120   ;;  %s226_s24 = smov [#allocation8]  }
   0xe   :  { %53 = vst.msk [vmem:[#allocation2 + $0x8] sm:$0xff] %vm51_vm0, %v225_v0  ;;  %v57_v6 = vld [vmem:[#allocation3 + $0x8] sm:$0xff]  ;;  %v142_v13 = vld [vmem:[%s276_s2] ss:$0 sm:$0xff]  ;;  %s114_s25 = sshll.u32 %s226_s24, 4  ;;  %s116_s28 = sshll.u32 %s277_s3, 4  ;;  %s115_s25 = int_to_ptr.vmem [resolvable:$true] %s114_s25  ;;  %s117_s28 = int_to_ptr.hbm [resolvable:$true] %s116_s28 }
   0xf   :  { %82 = vmatpush.msra.mxu0 %v60_v2  ;;  %133 = vmatpush.msra.mxu1 %v60_v2 }
  0x11   :  { %83 = vmatpush.msra.mxu0 %v59_v3  ;;  %134 = vmatpush.msra.mxu1 %v59_v3 }
  0x13   :  { %84 = vmatpush.msra.mxu0 %v58_v4  ;;  %135 = vmatpush.msra.mxu1 %v58_v4 }
  0x14   :  { %130 = vmatmul.msk.f32.vlgmr.msra.gmra.mxu0 %vm62_vm1, %v56_v5  ;;  %131 = vmatmul.msk.f32.vlgmr.msra.gmra.mxu1 %vm62_vm1, %v57_v6  ;;  %v54_v7 = vld [vmem:[#allocation2] sm:$0xff] }
  0x15   :  { %v55_v8 = vld [vmem:[#allocation2 + $0x8] sm:$0xff] }
  0x91   :  { %v86_v9 = vpop.f32.mrf.mxu0  ;;  %v89_v10 = vpop.f32.mrf.mxu1 }
  0x92   :  { %v92_v11 = vadd.f32 %v86_v9, %v54_v7  ;;  %v93_v12 = vadd.f32 %v89_v10, %v55_v8 }
  0x94   :  { %95 = vst.msk [vmem:[#allocation2] sm:$0xff] %vm51_vm0, %v92_v11 }
  0x95   :  { %96 = vst.msk [vmem:[#allocation2 + $0x8] sm:$0xff] %vm51_vm0, %v93_v12 }
  0x9b   :  { %v100_v14 = vld [vmem:[#allocation2] sm:$0xff] }
  0x9c   :  { %v101_v15 = vld [vmem:[#allocation2 + $0x8] sm:$0xff]  ;;  %v106_v16 = vadd.f32 %v142_v13, %v100_v14 }
  0x9d   :  { %v107_v17 = vadd.f32 %v142_v13, %v101_v15 }
  0x9e   :  { %108 = vst.msk [vmem:[#allocation8] sm:$0xff] %vm51_vm0, %v106_v16 }
  0x9f   :  { %109 = vst.msk [vmem:[#allocation8 + $0x8] sm:$0xff] %vm51_vm0, %v107_v17 }
  0xa0   :  { %122 = dma.vmem_to_hbm [thread:$0]  %s115_s25, 256, %s117_s28, [#allocation5], %s222_s20, %s222_s20, %s223_s21  }
  0xa1   :  { %219 = dma.done.wait [#allocation5], 256  }
  0xa2   :  { %220 = vsyncadd [#allocation5], 4294967040 }
  0xa3   :  { %127 = vsyncpa [#allocation4], 1 }
  0xa4   :  { %128 = vsyncpa [#allocation7], 1 }
  0xa5   :  { %129 = vsyncpa [#allocation5], 1 }

</bundles_post_ra>
